<compile_context>
chip_gen: v7x
topology: tpu7x:2x2x1
jax: 0.10.0
libtpu: 0.0.40
codegen_flags: <defaults>
</compile_context>

<pallas_src>
import functools

import jax
import jax.numpy as jnp
from jax import lax
from jax.experimental import pallas as pl
from jax.experimental.pallas import tpu as pltpu

BN_EPS = 1e-5
LEAKY_SLOPE = 0.2


def _round_up(x, m):
    return (x + m - 1) // m * m


def _vmem_limit_bytes():
    # ~75% of physical VMEM: ~96 MiB on v5e/v6e (128 MiB), ~48 MiB on v7x (64 MiB).
    try:
        cap = pltpu.get_tpu_info().vmem_capacity_bytes
    except Exception:
        cap = 64 * 1024 * 1024
    return int(min(cap * 3 // 4, 100 * 1024 * 1024))


_VMEM_LIMIT = _vmem_limit_bytes()


def _conv_stats_kernel(p_ref, w_ref, conv_ref, stats_ref, acc_ref, *, k_tile):
    """Tiled conv-as-matmul with a resident full-K weight slab per Cout tile.

    p_ref:     (R_TILE, K_TILE)    bf16 im2col patch tile (streamed over R, K)
    w_ref:     (K_PAD, COUT_TILE)  bf16 weight slab; its block index is constant
                                   across the R and K grid axes, so it is DMA'd
                                   once per Cout tile.
    conv_ref:  (R_TILE, COUT_TILE) bf16 conv output block (written at last K)
    stats_ref: (2, COUT_TILE)      f32 [sum; sumsq] (resident across R and K)
    acc_ref:   (R_TILE, COUT_TILE) f32 VMEM scratch accumulator
    """
    r_i = pl.program_id(1)
    k_i = pl.program_id(2)
    nk = pl.num_programs(2)

    @pl.when(jnp.logical_and(r_i == 0, k_i == 0))
    def _init_stats():
        stats_ref[...] = jnp.zeros_like(stats_ref)

    @pl.when(k_i == 0)
    def _init_acc():
        acc_ref[...] = jnp.zeros_like(acc_ref)

    k_start = pl.multiple_of(k_i * k_tile, k_tile)
    acc_ref[...] += jnp.dot(p_ref[...], w_ref[pl.ds(k_start, k_tile), :],
                            preferred_element_type=jnp.float32)

    @pl.when(k_i == nk - 1)
    def _finalize():
        blk = acc_ref[...]
        # One (2, COUT_TILE) accumulate instead of two 1-sublane masked stores.
        stats_ref[...] += jnp.concatenate(
            [jnp.sum(blk, axis=0, keepdims=True),
             jnp.sum(blk * blk, axis=0, keepdims=True)], axis=0)
        conv_ref[...] = blk.astype(conv_ref.dtype)


def _bn_lrelu_kernel(conv_ref, stats_ref, gamma_ref, beta_ref, out_ref, *,
                     inv_count):
    """BatchNorm2d (training-mode batch stats) + LeakyReLU(0.2) epilogue."""
    mean = stats_ref[0:1, :] * inv_count
    ex2 = stats_ref[1:2, :] * inv_count
    var = ex2 - mean * mean                       # biased variance (PyTorch norm)
    scale = gamma_ref[...] * lax.rsqrt(var + BN_EPS)    # folded per-channel scale
    shift = beta_ref[...] - mean * scale                # folded per-channel shift
    y = conv_ref[...].astype(jnp.float32) * scale + shift
    out_ref[...] = jnp.where(y >= 0.0, y, LEAKY_SLOPE * y)


def _im2col_nhwc(x_nhwc):
    """4x4 stride-2 pad-1 patches from NHWC. Returns (N*Ho*Wo, 16*C)."""
    n, h, w, c = x_nhwc.shape
    ho, wo = h // 2, w // 2
    x_pad = jnp.pad(x_nhwc, ((0, 0), (1, 1), (1, 1), (0, 0)))
    taps = []
    for kh in range(4):
        for kw in range(4):
            taps.append(x_pad[:, kh:kh + 2 * ho:2, kw:kw + 2 * wo:2, :])
    patches = jnp.stack(taps, axis=3)             # (N, Ho, Wo, 16, C)
    return patches.reshape(n * ho * wo, 16 * c)


@jax.jit
def unet_down(x_nchw, conv_w, gamma, beta):
    """x_nchw: (N, Cin, H, W). conv_w: (Cout, Cin, 4, 4) PyTorch OIHW layout."""
    n, cin, h, w = x_nchw.shape
    cout = conv_w.shape[0]
    ho, wo = h // 2, w // 2
    r = n * ho * wo

    # ---- Tile selection ----------------------------------------------------
    # K: pad Cin (not the im2col output) so K = 16*cin_pad is lane-aligned and
    # a multiple of k_tile -> no second full-size pad of the patches in HBM.
    if 16 * _round_up(cin, 8) <= 1024:
        cin_pad = _round_up(cin, 8)
        k_tile = 16 * cin_pad
    else:
        cin_pad = _round_up(cin, 64)              # 16*64 = 1024 divides k_pad
        k_tile = 1024
    k_pad = 16 * cin_pad

    # Cout: 256-wide tiles (v6e/v7x MXU is 256x256); 512 only for very wide
    # layers so there are always >= 2 Cout tiles (the megacore-parallel axis).
    cout_tile = min(512 if cout >= 1024 else 256, _round_up(cout, 128))
    cout_pad = _round_up(cout, cout_tile)

    # R: large tiles amortize grid-step overhead and cut operand re-streaming.
    r_tile = min(1024, _round_up(r, 16))
    r_pad = _round_up(r, r_tile)

    # ---- Operand prep (bf16 matmul operands; f32 accumulation in-kernel) ----
    x_nhwc = jnp.transpose(x_nchw, (0, 2, 3, 1)).astype(jnp.bfloat16)
    if cin_pad != cin:
        x_nhwc = jnp.pad(x_nhwc, ((0, 0), (0, 0), (0, 0), (0, cin_pad - cin)))
    patches = _im2col_nhwc(x_nhwc)                # (r, k_pad), K already aligned
    if r_pad != r:
        patches = jnp.pad(patches, ((0, r_pad - r), (0, 0)))

    # OIHW -> (kh, kw, cin, cout) -> (K, Cout); zero-padded channels contribute
    # exactly nothing to the conv output or the batch statistics.
    w_oihw = jnp.pad(conv_w, ((0, cout_pad - cout), (0, cin_pad - cin),
                              (0, 0), (0, 0)))
    w2d = jnp.transpose(w_oihw, (2, 3, 1, 0)).reshape(k_pad, cout_pad)
    w2d = w2d.astype(jnp.bfloat16)

    gamma2d = jnp.pad(gamma.astype(jnp.float32).reshape(1, cout),
                      ((0, 0), (0, cout_pad - cout)))
    beta2d = jnp.pad(beta.astype(jnp.float32).reshape(1, cout),
                     ((0, 0), (0, cout_pad - cout)))

    # ---- Kernel A: conv matmul + exact one-pass BN statistics ---------------
    grid_a = (cout_pad // cout_tile, r_pad // r_tile, k_pad // k_tile)
    conv_out, stats = pl.pallas_call(
        functools.partial(_conv_stats_kernel, k_tile=k_tile),
        out_shape=(jax.ShapeDtypeStruct((r_pad, cout_pad), jnp.bfloat16),
                   jax.ShapeDtypeStruct((2, cout_pad), jnp.float32)),
        grid=grid_a,
        in_specs=[
            pl.BlockSpec((r_tile, k_tile), lambda j, i, kk: (i, kk)),
            # Full-K weight slab: block index constant across (i, kk) -> DMA'd
            # once per Cout tile instead of once per (Cout, R) pair.
            pl.BlockSpec((k_pad, cout_tile), lambda j, i, kk: (0, j)),
        ],
        out_specs=(
            pl.BlockSpec((r_tile, cout_tile), lambda j, i, kk: (i, j)),
            pl.BlockSpec((2, cout_tile), lambda j, i, kk: (0, j)),
        ),
        scratch_shapes=[pltpu.VMEM((r_tile, cout_tile), jnp.float32)],
        compiler_params=pltpu.CompilerParams(
            # Cout is the only megacore-parallel axis; R must stay "arbitrary"
            # because the stats block is resident across it.
            dimension_semantics=("parallel", "arbitrary", "arbitrary"),
            vmem_limit_bytes=_VMEM_LIMIT),
        cost_estimate=pl.CostEstimate(
            flops=2 * r_pad * k_pad * cout_pad,
            transcendentals=0,
            bytes_accessed=(r_pad * k_pad * 2 * (cout_pad // cout_tile)
                            + k_pad * cout_pad * 2
                            + r_pad * cout_pad * 2
                            + 2 * cout_pad * 4)),
    )(patches, w2d)

    # ---- Kernel B: BN (folded scale/shift) + LeakyReLU ----------------------
    grid_b = (cout_pad // cout_tile, r_pad // r_tile)
    out_flat = pl.pallas_call(
        functools.partial(_bn_lrelu_kernel, inv_count=1.0 / float(r)),
        out_shape=jax.ShapeDtypeStruct((r_pad, cout_pad), jnp.float32),
        grid=grid_b,
        in_specs=[
            pl.BlockSpec((r_tile, cout_tile), lambda j, i: (i, j)),
            pl.BlockSpec((2, cout_tile), lambda j, i: (0, j)),
            pl.BlockSpec((1, cout_tile), lambda j, i: (0, j)),
            pl.BlockSpec((1, cout_tile), lambda j, i: (0, j)),
        ],
        out_specs=pl.BlockSpec((r_tile, cout_tile), lambda j, i: (i, j)),
        compiler_params=pltpu.CompilerParams(
            dimension_semantics=("parallel", "parallel"),
            vmem_limit_bytes=_VMEM_LIMIT),
    )(conv_out, stats, gamma2d, beta2d)

    out = out_flat[:r, :cout].reshape(n, ho, wo, cout)
    return jnp.transpose(out, (0, 3, 1, 2))


def _reference(x_nchw, conv_w, gamma, beta, *, bf16_like_kernel):
    """Pure-JAX reference mirroring PyTorch semantics (training-mode BN).

    bf16_like_kernel=True additionally mirrors the kernel's precision choices
    (bf16 matmul operands, f32 accumulation + f32 batch statistics, bf16 conv
    intermediate) so the comparison can be tight.
    """
    xq, wq = x_nchw, conv_w
    if bf16_like_kernel:
        xq = xq.astype(jnp.bfloat16).astype(jnp.float32)
        wq = wq.astype(jnp.bfloat16).astype(jnp.float32)
    y = lax.conv_general_dilated(
        xq, wq, window_strides=(2, 2), padding=((1, 1), (1, 1)),
        dimension_numbers=("NCHW", "OIHW", "NCHW"))
    mean = jnp.mean(y, axis=(0, 2, 3), keepdims=True)
    var = jnp.mean((y - mean) ** 2, axis=(0, 2, 3), keepdims=True)
    if bf16_like_kernel:
        y = y.astype(jnp.bfloat16).astype(jnp.float32)
    yn = (y - mean) * lax.rsqrt(var + BN_EPS)
    yn = yn * gamma.reshape(1, -1, 1, 1) + beta.reshape(1, -1, 1, 1)
    return jnp.where(yn >= 0.0, yn, LEAKY_SLOPE * yn)


if __name__ == "__main__":
    # Small shapes consistent with the module: N=2, Cin=4, H=W=16, Cout=8.
    N, CIN, H, W = 2, 4, 16, 16
    COUT = 8

    key = jax.random.PRNGKey(0)
    kx, kw, kg, kb = jax.random.split(key, 4)

    x = jax.random.normal(kx, (N, CIN, H, W), dtype=jnp.float32)
    # Conv2d(in=4, out=8, k=4, stride=2, pad=1, bias=False): weight (8, 4, 4, 4)
    conv_w = jax.random.normal(kw, (COUT, CIN, 4, 4), dtype=jnp.float32) * 0.1
    # BatchNorm2d(8) affine params (randomized to exercise the affine path).
    gamma = 1.0 + 0.1 * jax.random.normal(kg, (COUT,), dtype=jnp.float32)
    beta = 0.1 * jax.random.normal(kb, (COUT,), dtype=jnp.float32)

    out = jax.block_until_ready(unet_down(x, conv_w, gamma, beta))
    assert out.shape == (N, COUT, H // 2, W // 2), out.shape

    # Check vs a reference that matches the kernel's precision (bf16 operands,
    # f32 stats, bf16 conv intermediate).
    ref_bf16 = jax.block_until_ready(
        _reference(x, conv_w, gamma, beta, bf16_like_kernel=True))
    assert jnp.allclose(out, ref_bf16, atol=1e-2, rtol=1e-2), (
        float(jnp.max(jnp.abs(out - ref_bf16))))

    # Loose check vs the full-f32 PyTorch-faithful reference.
    ref_f32 = jax.block_until_ready(
        _reference(x, conv_w, gamma, beta, bf16_like_kernel=False))
    assert jnp.allclose(out, ref_f32, atol=5e-2, rtol=5e-2), (
        float(jnp.max(jnp.abs(out - ref_f32))))

    print("KERNEL_OK")
</pallas_src>

<mosaic_0001>
module attributes {stable_mosaic.version = 11 : i64} {
  func.func @_bn_lrelu_kernel(%arg0: i32, %arg1: i32, %arg2: memref<128x128xbf16, #tpu.memory_space<vmem>>, %arg3: memref<2x128xf32, #tpu.memory_space<vmem>>, %arg4: memref<1x128xf32, #tpu.memory_space<vmem>>, %arg5: memref<1x128xf32, #tpu.memory_space<vmem>>, %arg6: memref<128x128xf32, #tpu.memory_space<vmem>>) attributes {dimension_semantics = [#tpu.dimension_semantics<parallel>, #tpu.dimension_semantics<parallel>], iteration_bounds = array<i64: 1, 1>, scalar_prefetch = 0 : i64, scratch_operands = 0 : i64, tpu.core_type = #tpu.core_type<tc>, window_params = [{transform_indices = @transform_0, window_bounds = array<i64: 128, 128>}, {transform_indices = @transform_1, window_bounds = array<i64: 2, 128>}, {transform_indices = @transform_2, window_bounds = array<i64: 1, 128>}, {transform_indices = @transform_3, window_bounds = array<i64: 1, 128>}, {transform_indices = @transform_4, window_bounds = array<i64: 128, 128>}]} {
    %c0 = arith.constant 0 : index
    %c0_0 = arith.constant 0 : index
    %0 = vector.load %arg3[%c0, %c0_0] : memref<2x128xf32, #tpu.memory_space<vmem>>, vector<1x128xf32>
    %cst = arith.constant 7.812500e-03 : f32
    %1 = vector.broadcast %cst : f32 to vector<1x128xf32>
    %2 = arith.mulf %0, %1 : vector<1x128xf32>
    %c1 = arith.constant 1 : index
    %c0_1 = arith.constant 0 : index
    %3 = vector.load %arg3[%c1, %c0_1] : memref<2x128xf32, #tpu.memory_space<vmem>>, vector<1x128xf32>
    %cst_2 = arith.constant 7.812500e-03 : f32
    %4 = vector.broadcast %cst_2 : f32 to vector<1x128xf32>
    %5 = arith.mulf %3, %4 : vector<1x128xf32>
    %6 = arith.mulf %2, %2 : vector<1x128xf32>
    %7 = arith.subf %5, %6 : vector<1x128xf32>
    %c0_3 = arith.constant 0 : index
    %c0_4 = arith.constant 0 : index
    %8 = vector.load %arg4[%c0_3, %c0_4] : memref<1x128xf32, #tpu.memory_space<vmem>>, vector<1x128xf32>
    %cst_5 = arith.constant 9.99999974E-6 : f32
    %9 = vector.broadcast %cst_5 : f32 to vector<1x128xf32>
    %10 = arith.addf %7, %9 : vector<1x128xf32>
    %11 = math.rsqrt %10 : vector<1x128xf32>
    %12 = arith.mulf %8, %11 : vector<1x128xf32>
    %c0_6 = arith.constant 0 : index
    %c0_7 = arith.constant 0 : index
    %13 = vector.load %arg5[%c0_6, %c0_7] : memref<1x128xf32, #tpu.memory_space<vmem>>, vector<1x128xf32>
    %14 = arith.mulf %2, %12 : vector<1x128xf32>
    %15 = arith.subf %13, %14 : vector<1x128xf32>
    %c0_8 = arith.constant 0 : index
    %c0_9 = arith.constant 0 : index
    %16 = vector.load %arg2[%c0_8, %c0_9] : memref<128x128xbf16, #tpu.memory_space<vmem>>, vector<128x128xbf16>
    %17 = arith.extf %16 : vector<128x128xbf16> to vector<128x128xf32>
    %18 = vector.broadcast %12 : vector<1x128xf32> to vector<128x128xf32>
    %19 = arith.mulf %17, %18 : vector<128x128xf32>
    %20 = vector.broadcast %15 : vector<1x128xf32> to vector<128x128xf32>
    %21 = arith.addf %19, %20 : vector<128x128xf32>
    %cst_10 = arith.constant 0.000000e+00 : f32
    %22 = vector.broadcast %cst_10 : f32 to vector<128x128xf32>
    %23 = arith.cmpf oge, %21, %22 : vector<128x128xf32>
    %cst_11 = arith.constant 2.000000e-01 : f32
    %24 = vector.broadcast %cst_11 : f32 to vector<128x128xf32>
    %25 = arith.mulf %24, %21 : vector<128x128xf32>
    %26 = arith.select %23, %21, %25 : vector<128x128xi1>, vector<128x128xf32>
    %c0_12 = arith.constant 0 : index
    %c0_13 = arith.constant 0 : index
    %27 = vector.load %arg6[%c0_12, %c0_13] : memref<128x128xf32, #tpu.memory_space<vmem>>, vector<128x128xf32>
    tpu.vector_store %arg6[%c0_12, %c0_13], %26 {strides = array<i32>} : memref<128x128xf32, #tpu.memory_space<vmem>>, vector<128x128xf32>,
    return
  }
  func.func @transform_0(%arg0: i32, %arg1: i32) -> (i32, i32) {
    %c0_i32 = arith.constant 0 : i32
    return %arg1, %arg0 : i32, i32
  }
  func.func @transform_1(%arg0: i32, %arg1: i32) -> (i32, i32) {
    %c0_i32 = arith.constant 0 : i32
    %c0_i32_0 = arith.constant 0 : i32
    return %c0_i32, %arg0 : i32, i32
  }
  func.func @transform_2(%arg0: i32, %arg1: i32) -> (i32, i32) {
    %c0_i32 = arith.constant 0 : i32
    %c0_i32_0 = arith.constant 0 : i32
    return %c0_i32, %arg0 : i32, i32
  }
  func.func @transform_3(%arg0: i32, %arg1: i32) -> (i32, i32) {
    %c0_i32 = arith.constant 0 : i32
    %c0_i32_0 = arith.constant 0 : i32
    return %c0_i32, %arg0 : i32, i32
  }
  func.func @transform_4(%arg0: i32, %arg1: i32) -> (i32, i32) {
    %c0_i32 = arith.constant 0 : i32
    return %arg1, %arg0 : i32, i32
  }
}

module attributes {stable_mosaic.version = 11 : i64} {
  func.func @_conv_stats_kernel(%arg0: i32, %arg1: i32, %arg2: i32, %arg3: memref<128x128xbf16, #tpu.memory_space<vmem>>, %arg4: memref<128x128xbf16, #tpu.memory_space<vmem>>, %arg5: memref<128x128xbf16, #tpu.memory_space<vmem>>, %arg6: memref<2x128xf32, #tpu.memory_space<vmem>>, %arg7: memref<128x128xf32, #tpu.memory_space<vmem>>) attributes {dimension_semantics = [#tpu.dimension_semantics<parallel>, #tpu.dimension_semantics<arbitrary>, #tpu.dimension_semantics<arbitrary>], iteration_bounds = array<i64: 1, 1, 1>, scalar_prefetch = 0 : i64, scratch_operands = 1 : i64, tpu.core_type = #tpu.core_type<tc>, window_params = [{transform_indices = @transform_0, window_bounds = array<i64: 128, 128>}, {transform_indices = @transform_1, window_bounds = array<i64: 128, 128>}, {transform_indices = @transform_2, window_bounds = array<i64: 128, 128>}, {transform_indices = @transform_3, window_bounds = array<i64: 2, 128>}]} {
    %c0_i32 = arith.constant 0 : i32
    %0 = arith.cmpi eq, %arg1, %c0_i32 : i32
    %c0_i32_0 = arith.constant 0 : i32
    %1 = arith.cmpi eq, %arg2, %c0_i32_0 : i32
    %2 = arith.andi %0, %1 : i1
    %3 = arith.extui %2 : i1 to i32
    %c0_i32_1 = arith.constant 0 : i32
    %4 = arith.cmpi ne, %3, %c0_i32_1 : i32
    scf.if %4 {
      %cst_12 = arith.constant 0.000000e+00 : f32
      %20 = vector.broadcast %cst_12 : f32 to vector<2x128xf32>
      %c0_13 = arith.constant 0 : index
      %c0_14 = arith.constant 0 : index
      %21 = vector.load %arg6[%c0_13, %c0_14] : memref<2x128xf32, #tpu.memory_space<vmem>>, vector<2x128xf32>
      tpu.vector_store %arg6[%c0_13, %c0_14], %20 {strides = array<i32>} : memref<2x128xf32, #tpu.memory_space<vmem>>, vector<2x128xf32>,
    } else {
    }
    %c0_i32_2 = arith.constant 0 : i32
    %5 = arith.cmpi eq, %arg2, %c0_i32_2 : i32
    %6 = arith.extui %5 : i1 to i32
    %c0_i32_3 = arith.constant 0 : i32
    %7 = arith.cmpi ne, %6, %c0_i32_3 : i32
    scf.if %7 {
      %cst_12 = arith.constant 0.000000e+00 : f32
      %20 = vector.broadcast %cst_12 : f32 to vector<128x128xf32>
      %c0_13 = arith.constant 0 : index
      %c0_14 = arith.constant 0 : index
      %21 = vector.load %arg7[%c0_13, %c0_14] : memref<128x128xf32, #tpu.memory_space<vmem>>, vector<128x128xf32>
      tpu.vector_store %arg7[%c0_13, %c0_14], %20 {strides = array<i32>} : memref<128x128xf32, #tpu.memory_space<vmem>>, vector<128x128xf32>,
    } else {
    }
    %c128_i32 = arith.constant 128 : i32
    %8 = arith.muli %arg2, %c128_i32 : i32
    %9 = tpu.assume_multiple %8, 128 : i32
    %c0 = arith.constant 0 : index
    %c0_4 = arith.constant 0 : index
    %10 = vector.load %arg7[%c0, %c0_4] : memref<128x128xf32, #tpu.memory_space<vmem>>, vector<128x128xf32>
    %c0_5 = arith.constant 0 : index
    %c0_6 = arith.constant 0 : index
    %11 = vector.load %arg3[%c0_5, %c0_6] : memref<128x128xbf16, #tpu.memory_space<vmem>>, vector<128x128xbf16>
    %12 = arith.index_cast %9 : i32 to index
    %c0_7 = arith.constant 0 : index
    %13 = vector.load %arg4[%12, %c0_7] : memref<128x128xbf16, #tpu.memory_space<vmem>>, vector<128x128xbf16>
    %cst = arith.constant dense<0.000000e+00> : vector<128x128xf32>
    %14 = tpu.matmul %11, %13, %cst {dimension_numbers = #tpu.dot_dimension_numbers<[1], [0], [0], [1], [0, 0, 1, 1], [], []>} : vector<128x128xbf16>, vector<128x128xbf16>, vector<128x128xf32> -> vector<128x128xf32>
    %15 = arith.addf %10, %14 : vector<128x128xf32>
    %c0_8 = arith.constant 0 : index
    %c0_9 = arith.constant 0 : index
    %16 = vector.load %arg7[%c0_8, %c0_9] : memref<128x128xf32, #tpu.memory_space<vmem>>, vector<128x128xf32>
    tpu.vector_store %arg7[%c0_8, %c0_9], %15 {strides = array<i32>} : memref<128x128xf32, #tpu.memory_space<vmem>>, vector<128x128xf32>,
    %c0_i32_10 = arith.constant 0 : i32
    %17 = arith.cmpi eq, %arg2, %c0_i32_10 : i32
    %18 = arith.extui %17 : i1 to i32
    %c0_i32_11 = arith.constant 0 : i32
    %19 = arith.cmpi ne, %18, %c0_i32_11 : i32
    scf.if %19 {
      %c0_12 = arith.constant 0 : index
      %c0_13 = arith.constant 0 : index
      %20 = vector.load %arg7[%c0_12, %c0_13] : memref<128x128xf32, #tpu.memory_space<vmem>>, vector<128x128xf32>
      %c0_14 = arith.constant 0 : index
      %c0_15 = arith.constant 0 : index
      %21 = vector.load %arg6[%c0_14, %c0_15] : memref<2x128xf32, #tpu.memory_space<vmem>>, vector<2x128xf32>
      %cst_16 = arith.constant dense<0.000000e+00> : vector<128xf32>
      %22 = vector.multi_reduction <add>, %20, %cst_16 [0] : vector<128x128xf32> to vector<128xf32>
      %23 = vector.shape_cast %22 : vector<128xf32> to vector<1x128xf32>
      %24 = arith.mulf %20, %20 : vector<128x128xf32>
      %cst_17 = arith.constant dense<0.000000e+00> : vector<128xf32>
      %25 = vector.multi_reduction <add>, %24, %cst_17 [0] : vector<128x128xf32> to vector<128xf32>
      %26 = vector.shape_cast %25 : vector<128xf32> to vector<1x128xf32>
      %27 = tpu.concatenate %23, %26 in 0 : vector<1x128xf32>, vector<1x128xf32> -> vector<2x128xf32>
      %28 = arith.addf %21, %27 : vector<2x128xf32>
      %c0_18 = arith.constant 0 : index
      %c0_19 = arith.constant 0 : index
      %29 = vector.load %arg6[%c0_18, %c0_19] : memref<2x128xf32, #tpu.memory_space<vmem>>, vector<2x128xf32>
      tpu.vector_store %arg6[%c0_18, %c0_19], %28 {strides = array<i32>} : memref<2x128xf32, #tpu.memory_space<vmem>>, vector<2x128xf32>,
      %30 = arith.truncf %20 : vector<128x128xf32> to vector<128x128xbf16>
      %c0_20 = arith.constant 0 : index
      %c0_21 = arith.constant 0 : index
      %31 = vector.load %arg5[%c0_20, %c0_21] : memref<128x128xbf16, #tpu.memory_space<vmem>>, vector<128x128xbf16>
      tpu.vector_store %arg5[%c0_20, %c0_21], %30 {strides = array<i32>} : memref<128x128xbf16, #tpu.memory_space<vmem>>, vector<128x128xbf16>,
    } else {
    }
    return
  }
  func.func @transform_0(%arg0: i32, %arg1: i32, %arg2: i32) -> (i32, i32) {
    %c0_i32 = arith.constant 0 : i32
    return %arg1, %arg2 : i32, i32
  }
  func.func @transform_1(%arg0: i32, %arg1: i32, %arg2: i32) -> (i32, i32) {
    %c0_i32 = arith.constant 0 : i32
    %c0_i32_0 = arith.constant 0 : i32
    return %c0_i32, %arg0 : i32, i32
  }
  func.func @transform_2(%arg0: i32, %arg1: i32, %arg2: i32) -> (i32, i32) {
    %c0_i32 = arith.constant 0 : i32
    return %arg1, %arg0 : i32, i32
  }
  func.func @transform_3(%arg0: i32, %arg1: i32, %arg2: i32) -> (i32, i32) {
    %c0_i32 = arith.constant 0 : i32
    %c0_i32_0 = arith.constant 0 : i32
    return %c0_i32, %arg0 : i32, i32
  }
}

</mosaic_0001>

<bundles_post_ra>
// kernel: unet_down.3
= control target key start
LH: loop header
LB: loop body
LE: loop exit
PB: predicated region body
PF: predicated region fallthrough
CT: control target
= control target key end

     0   :  { %v63_v7 = vlaneseq  ;;  %s368_s1 = inlined_call_operand.vmem [shape: f32[2,128], index: 1, kind: input, shape index: {}]   ;;  %s369_s0 = inlined_call_operand.vmem [shape: bf16[128,128], index: 0, kind: input, shape index: {}]   ;;  %s370_s2 = inlined_call_operand.vmem [shape: f32[1,128], index: 2, kind: input, shape index: {}]   ;;  %s371_s3 = inlined_call_operand.vmem [shape: f32[1,128], index: 3, kind: input, shape index: {}]   ;;  %s372_s4 = inlined_call_operand.vmem [shape: f32[128,128], index: 4, kind: output, shape index: {}]  }
   0x1   :  { %v17_v0 = vld [vmem:[%s368_s1] sm:$0x1]  ;;  %v19_v1 = vld [vmem:[%s368_s1 + $0x1] sm:$0x1]  ;;  %v206_v10 = vld [vmem:[%s369_s0 + $0x8] sm:$0xff]  }
   0x2   :  { %v18_v2 = vmul.f32 0.0078125, %v17_v0  ;;  %v20_v3 = vmul.f32 0.0078125, %v19_v1  ;;  %v64_v8 = vshrl.u32 %v63_v7, 7  ;;  %v175_v9 = vld [vmem:[%s369_s0] sm:$0xff]   ;;  %v207_v12 = vld [vmem:[%s369_s0 + $0x10] sm:$0xff]   ;;  %v208_v14 = vld [vmem:[%s369_s0 + $0x18] sm:$0xff]   ;;  %v180_v19 = vunpack.c.l.bf16 %v206_v10 }
   0x3   :  { %v23_v11 = vld [vmem:[%s370_s2] sm:$0x1]  ;;  %v176_v17 = vunpack.c.l.bf16 %v175_v9  ;;  %v177_v18 = vunpack.c.h.bf16 %v175_v9  ;;  %v210_v20 = vld [vmem:[%s369_s0 + $0x28] sm:$0xff]   ;;  %v181_v22 = vunpack.c.h.bf16 %v206_v10  ;;  %v184_v23 = vunpack.c.l.bf16 %v207_v12  ;;  %v211_v25 = vld [vmem:[%s369_s0 + $0x30] sm:$0xff]  }
   0x4   :  { %v21_v4 = vmul.f32 %v18_v2, %v18_v2  ;;  %v65_v13 = vsub.s32 0, %v64_v8  ;;  %v209_v15 = vld [vmem:[%s369_s0 + $0x20] sm:$0xff]   ;;  %v185_v24 = vunpack.c.h.bf16 %v207_v12  ;;  %v273_v26 = vld [vmem:[%s369_s0 + $0x38] sm:$0xff]   ;;  %v188_v28 = vunpack.c.l.bf16 %v208_v14 }
   0x5   :  { %v27_v27 = vld [vmem:[%s371_s3] sm:$0x1]  ;;  %v189_v29 = vunpack.c.h.bf16 %v208_v14  ;;  %v192_v30 = vunpack.c.l.bf16 %v209_v15  ;;  %v193_v31 = vunpack.c.h.bf16 %v209_v15  ;;  %v196_v34 = vunpack.c.l.bf16 %v210_v20 }
   0x6   :  { %v22_v5 = vsub.f32 %v20_v3, %v21_v4  ;;  %v197_v35 = vunpack.c.h.bf16 %v210_v20  ;;  %v200_v36 = vunpack.c.l.bf16 %v211_v25  ;;  %v201_v37 = vunpack.c.h.bf16 %v211_v25 }
   0x7   :  { %v204_v38 = vunpack.c.l.bf16 %v273_v26  ;;  %v205_v39 = vunpack.c.h.bf16 %v273_v26 }
   0x8   :  { %v24_v6 = vadd.f32 1e-05, %v22_v5 }
   0xa   :  { %213 = vrsqrt.f32 %v24_v6 }
  0x14   :  { %v214_v16 = vpop.eup %213 }
  0x15   :  { %v26_v21 = vmul.f32 %v214_v16, %v23_v11 }
  0x17   :  { %v28_v32 = vmul.f32 %v26_v21, %v18_v2  ;;  %v278_v33 = vrot.slane %v26_v21, %v65_v13 }
  0x19   :  { %v29_v40 = vsub.f32 %v27_v27, %v28_v32  ;;  %v68_v41 = vmul.f32 %v176_v17, %v278_v33  ;;  %v69_v42 = vmul.f32 %v177_v18, %v278_v33  ;;  %v70_v43 = vmul.f32 %v180_v19, %v278_v33 }
  0x1a   :  { %v71_v44 = vmul.f32 %v181_v22, %v278_v33  ;;  %v72_v45 = vmul.f32 %v184_v23, %v278_v33  ;;  %v73_v46 = vmul.f32 %v185_v24, %v278_v33  ;;  %v74_v47 = vmul.f32 %v188_v28, %v278_v33 }
  0x1b   :  { %v289_v48 = vrot.slane %v29_v40, %v65_v13  ;;  %v75_v49 = vmul.f32 %v189_v29, %v278_v33  ;;  %v76_v50 = vmul.f32 %v192_v30, %v278_v33  ;;  %v77_v51 = vmul.f32 %v193_v31, %v278_v33 }
  0x1c   :  { %v78_v52 = vmul.f32 %v196_v34, %v278_v33  ;;  %v79_v53 = vmul.f32 %v197_v35, %v278_v33  ;;  %v80_v54 = vmul.f32 %v200_v36, %v278_v33  ;;  %v81_v55 = vmul.f32 %v201_v37, %v278_v33 }
  0x1d   :  { %v90_v56 = vadd.f32 %v289_v48, %v68_v41  ;;  %v91_v57 = vadd.f32 %v289_v48, %v69_v42  ;;  %v92_v58 = vadd.f32 %v289_v48, %v70_v43  ;;  %v93_v59 = vadd.f32 %v289_v48, %v71_v44 }
  0x1e   :  { %v94_v60 = vadd.f32 %v289_v48, %v72_v45  ;;  %v95_v61 = vadd.f32 %v289_v48, %v73_v46  ;;  %v96_v62 = vadd.f32 %v289_v48, %v74_v47  ;;  %v97_v63 = vadd.f32 %v289_v48, %v75_v49 }
  0x1f   :  { %vm106_vm0 = vcmp.ge.f32.partialorder %v90_v56, 0.0  ;;  %v122_v0 = vmul.f32 0.2, %v90_v56  ;;  %vm107_vm1 = vcmp.ge.f32.partialorder %v91_v57, 0.0  ;;  %v123_v1 = vmul.f32 0.2, %v91_v57 }
  0x20   :  { %vm108_vm2 = vcmp.ge.f32.partialorder %v92_v58, 0.0  ;;  %v124_v2 = vmul.f32 0.2, %v92_v58  ;;  %vm109_vm3 = vcmp.ge.f32.partialorder %v93_v59, 0.0  ;;  %v125_v3 = vmul.f32 0.2, %v93_v59 }
  0x21   :  { %v138_v4 = vsel %vm106_vm0, %v90_v56, %v122_v0  ;;  %v139_v5 = vsel %vm107_vm1, %v91_v57, %v123_v1  ;;  %vm110_vm4 = vcmp.ge.f32.partialorder %v94_v60, 0.0  ;;  %v126_v6 = vmul.f32 0.2, %v94_v60 }
  0x22   :  { %154 = vst [vmem:[%s372_s4] sm:$0xff] %v138_v4  ;;  %155 = vst [vmem:[%s372_s4 + $0x8] sm:$0xff] %v139_v5  ;;  %v140_v7 = vsel %vm108_vm2, %v92_v58, %v124_v2  ;;  %v141_v8 = vsel %vm109_vm3, %v93_v59, %v125_v3  ;;  %vm111_vm5 = vcmp.ge.f32.partialorder %v95_v61, 0.0  ;;  %v127_v9 = vmul.f32 0.2, %v95_v61 }
  0x23   :  { %156 = vst [vmem:[%s372_s4 + $0x10] sm:$0xff] %v140_v7  ;;  %157 = vst [vmem:[%s372_s4 + $0x18] sm:$0xff] %v141_v8  ;;  %v142_v10 = vsel %vm110_vm4, %v94_v60, %v126_v6  ;;  %vm112_vm6 = vcmp.ge.f32.partialorder %v96_v62, 0.0  ;;  %v128_v11 = vmul.f32 0.2, %v96_v62  ;;  %vm113_vm7 = vcmp.ge.f32.partialorder %v97_v63, 0.0 }
  0x24   :  { %158 = vst [vmem:[%s372_s4 + $0x20] sm:$0xff] %v142_v10  ;;  %v143_v12 = vsel %vm111_vm5, %v95_v61, %v127_v9  ;;  %v129_v13 = vmul.f32 0.2, %v97_v63  ;;  %v98_v14 = vadd.f32 %v289_v48, %v76_v50  ;;  %v99_v15 = vadd.f32 %v289_v48, %v77_v51 }
  0x25   :  { %159 = vst [vmem:[%s372_s4 + $0x28] sm:$0xff] %v143_v12  ;;  %v144_v16 = vsel %vm112_vm6, %v96_v62, %v128_v11  ;;  %v100_v17 = vadd.f32 %v289_v48, %v78_v52  ;;  %v101_v18 = vadd.f32 %v289_v48, %v79_v53  ;;  %v102_v19 = vadd.f32 %v289_v48, %v80_v54 }
  0x26   :  { %160 = vst [vmem:[%s372_s4 + $0x30] sm:$0xff] %v144_v16  ;;  %v145_v20 = vsel %vm113_vm7, %v97_v63, %v129_v13  ;;  %vm114_vm8 = vcmp.ge.f32.partialorder %v98_v14, 0.0  ;;  %v130_v21 = vmul.f32 0.2, %v98_v14  ;;  %vm115_vm9 = vcmp.ge.f32.partialorder %v99_v15, 0.0 }
  0x27   :  { %161 = vst [vmem:[%s372_s4 + $0x38] sm:$0xff] %v145_v20  ;;  %v131_v22 = vmul.f32 0.2, %v99_v15  ;;  %vm116_vm10 = vcmp.ge.f32.partialorder %v100_v17, 0.0  ;;  %v132_v23 = vmul.f32 0.2, %v100_v17  ;;  %v103_v30 = vadd.f32 %v289_v48, %v81_v55 }
  0x28   :  { %vm117_vm11 = vcmp.ge.f32.partialorder %v101_v18, 0.0  ;;  %v146_v24 = vsel %vm114_vm8, %v98_v14, %v130_v21  ;;  %v133_v25 = vmul.f32 0.2, %v101_v18  ;;  %vm118_vm12 = vcmp.ge.f32.partialorder %v102_v19, 0.0 }
  0x29   :  { %v134_v27 = vmul.f32 0.2, %v102_v19  ;;  %162 = vst [vmem:[%s372_s4 + $0x40] sm:$0xff] %v146_v24  ;;  %v147_v28 = vsel %vm115_vm9, %v99_v15, %v131_v22  ;;  %v148_v29 = vsel %vm116_vm10, %v100_v17, %v132_v23  ;;  %v82_v31 = vmul.f32 %v204_v38, %v278_v33 }
  0x2a   :  { %163 = vst [vmem:[%s372_s4 + $0x48] sm:$0xff] %v147_v28  ;;  %164 = vst [vmem:[%s372_s4 + $0x50] sm:$0xff] %v148_v29  ;;  %v149_v32 = vsel %vm117_vm11, %v101_v18, %v133_v25  ;;  %v83_v35 = vmul.f32 %v205_v39, %v278_v33  ;;  %vm119_vm13 = vcmp.ge.f32.partialorder %v103_v30, 0.0  ;;  %v135_v36 = vmul.f32 0.2, %v103_v30 }
  0x2b   :  { %v150_v34 = vsel %vm118_vm12, %v102_v19, %v134_v27  ;;  %165 = vst [vmem:[%s372_s4 + $0x58] sm:$0xff] %v149_v32  ;;  %v104_v37 = vadd.f32 %v289_v48, %v82_v31 }
  0x2c   :  { %166 = vst [vmem:[%s372_s4 + $0x60] sm:$0xff] %v150_v34  ;;  %v105_v38 = vadd.f32 %v289_v48, %v83_v35  ;;  %v151_v40 = vsel %vm119_vm13, %v103_v30, %v135_v36 }
  0x2d   :  { %vm120_vm14 = vcmp.ge.f32.partialorder %v104_v37, 0.0  ;;  %v136_v41 = vmul.f32 0.2, %v104_v37  ;;  %167 = vst [vmem:[%s372_s4 + $0x68] sm:$0xff] %v151_v40 }
  0x2e   :  { %vm121_vm15 = vcmp.ge.f32.partialorder %v105_v38, 0.0  ;;  %v137_v26 = vmul.f32 0.2, %v105_v38 }
  0x2f   :  { %v152_v33 = vsel %vm120_vm14, %v104_v37, %v136_v41 }
  0x30   :  { %168 = vst [vmem:[%s372_s4 + $0x70] sm:$0xff] %v152_v33  ;;  %v153_v39 = vsel %vm121_vm15, %v105_v38, %v137_v26 }
  0x31   :  { %169 = vst [vmem:[%s372_s4 + $0x78] sm:$0xff] %v153_v39 }

// kernel: unet_down.2
= control target key start
LH: loop header
LB: loop body
LE: loop exit
PB: predicated region body
PF: predicated region fallthrough
CT: control target
= control target key end

     0   :  { %v666_v16 = vmov 0.0   ;;  %vm396_vm0 = vcmask 1040384   ;;  %s768_s1 = inlined_call_operand.vmem [shape: bf16[128,128], index: 1, kind: input, shape index: {}]   ;;  %s769_s0 = inlined_call_operand.vmem [shape: bf16[128,128], index: 0, kind: input, shape index: {}]   ;;  %s770_s3 = inlined_call_operand.vmem [shape: f32[2,128], index: 3, kind: output, shape index: {1}]   ;;  %s771_s2 = inlined_call_operand.vmem [shape: bf16[128,128], index: 2, kind: output, shape index: {0}]  }
   0x1   :  { %v650_v0 = vld [vmem:[%s768_s1] sm:$0xff]   ;;  %v651_v1 = vld [vmem:[%s768_s1 + $0x8] sm:$0xff]   ;;  %v652_v2 = vld [vmem:[%s768_s1 + $0x10] sm:$0xff]   ;;  %20 = vst [vmem:[%s770_s3] sm:$0x3] %v666_v16 }
   0x2   :  { %601 = vmatprep.subr.bf16.mxu0 %v650_v0  ;;  %633 = vmatprep.subr.bf16.mxu1 %v650_v0  ;;  %v653_v3 = vld [vmem:[%s768_s1 + $0x18] sm:$0xff]   ;;  %v658_v4 = vld [vmem:[%s769_s0] sm:$0xff]   ;;  %v655_v7 = vld [vmem:[%s768_s1 + $0x28] sm:$0xff]  }
   0x3   :  { %602 = vmatpush3.bf16.msra.mxu0 %v650_v0  ;;  %641 = vmatpush3.bf16.msra.mxu1 %v650_v0  ;;  %v654_v5 = vld [vmem:[%s768_s1 + $0x20] sm:$0xff]   ;;  %v656_v8 = vld [vmem:[%s768_s1 + $0x30] sm:$0xff]   ;;  %v657_v9 = vld [vmem:[%s768_s1 + $0x38] sm:$0xff]  }
   0x4   :  { %603 = vmatprep.subr.bf16.mxu0 %v651_v1  ;;  %634 = vmatprep.subr.bf16.mxu1 %v651_v1  ;;  %v662_v6 = vld [vmem:[%s769_s0 + $0x20] sm:$0xff]   ;;  %v659_v10 = vld [vmem:[%s769_s0 + $0x8] sm:$0xff]   ;;  %v660_v12 = vld [vmem:[%s769_s0 + $0x10] sm:$0xff]  }
   0x5   :  { %617 = vmatprep.mubr.bf16.mxu0 %v658_v4  ;;  %625 = vmatprep.mubr.bf16.mxu1 %v662_v6  ;;  %v663_v11 = vld [vmem:[%s769_s0 + $0x28] sm:$0xff]   ;;  %v664_v13 = vld [vmem:[%s769_s0 + $0x30] sm:$0xff]   ;;  %v661_v14 = vld [vmem:[%s769_s0 + $0x18] sm:$0xff]  }
   0x6   :  { %v665_v15 = vld [vmem:[%s769_s0 + $0x38] sm:$0xff]  }
   0x7   :  { %604 = vmatpush3.bf16.msra.mxu0 %v651_v1  ;;  %642 = vmatpush3.bf16.msra.mxu1 %v651_v1 }
   0x8   :  { %605 = vmatprep.subr.bf16.mxu0 %v652_v2  ;;  %635 = vmatprep.subr.bf16.mxu1 %v652_v2 }
   0xb   :  { %606 = vmatpush3.bf16.msra.mxu0 %v652_v2  ;;  %643 = vmatpush3.bf16.msra.mxu1 %v652_v2 }
   0xc   :  { %607 = vmatprep.subr.bf16.mxu0 %v653_v3  ;;  %636 = vmatprep.subr.bf16.mxu1 %v653_v3 }
   0xf   :  { %608 = vmatpush3.bf16.msra.mxu0 %v653_v3  ;;  %644 = vmatpush3.bf16.msra.mxu1 %v653_v3 }
  0x10   :  { %609 = vmatprep.subr.bf16.mxu0 %v654_v5  ;;  %637 = vmatprep.subr.bf16.mxu1 %v654_v5 }
  0x13   :  { %610 = vmatpush3.bf16.msra.mxu0 %v654_v5  ;;  %645 = vmatpush3.bf16.msra.mxu1 %v654_v5 }
  0x14   :  { %611 = vmatprep.subr.bf16.mxu0 %v655_v7  ;;  %638 = vmatprep.subr.bf16.mxu1 %v655_v7 }
  0x17   :  { %612 = vmatpush3.bf16.msra.mxu0 %v655_v7  ;;  %646 = vmatpush3.bf16.msra.mxu1 %v655_v7 }
  0x18   :  { %613 = vmatprep.subr.bf16.mxu0 %v656_v8  ;;  %639 = vmatprep.subr.bf16.mxu1 %v656_v8 }
  0x1b   :  { %614 = vmatpush3.bf16.msra.mxu0 %v656_v8  ;;  %647 = vmatpush3.bf16.msra.mxu1 %v656_v8 }
  0x1c   :  { %615 = vmatprep.subr.bf16.mxu0 %v657_v9  ;;  %640 = vmatprep.subr.bf16.mxu1 %v657_v9 }
  0x1f   :  { %616 = vmatpush3.bf16.msra.mxu0 %v657_v9  ;;  %648 = vmatpush3.bf16.msra.mxu1 %v657_v9 }
  0x22   :  { %618 = vmatmul.mubr.bf16.vlgmr.msra.gmra.mrb[0].mxu0 %v659_v10  ;;  %626 = vmatmul.mubr.bf16.vlgmr.msra.gmra.mrb[0].mxu1 %v663_v11 }
  0x23   :  { %621 = vmatprep.mubr.bf16.mxu0 %v660_v12  ;;  %629 = vmatprep.mubr.bf16.mxu1 %v664_v13 }
  0x2a   :  { %622 = vmatmul.mubr.bf16.gmra.mrb[4].mxu0 %v661_v14  ;;  %630 = vmatmul.mubr.bf16.gmra.mrb[4].mxu1 %v665_v15 }
  0xf5   :  { %v619_v17 = vpop.f32.mrb[0].mxu0  ;;  %v627_v18 = vpop.f32.mrb[0].mxu1 }
  0xf6   :  { %v223_v19 = vpop.f32.mrb[1].mxu0  ;;  %v255_v20 = vpop.f32.mrb[1].mxu1  ;;  %v361_v32 = vmul.f32 %v619_v17, %v619_v17  ;;  %v369_v4 = vmul.f32 %v627_v18, %v627_v18 }
  0xf7   :  { %v620_v21 = vpop.f32.mrb[2].mxu0  ;;  %v628_v22 = vpop.f32.mrb[2].mxu1  ;;  %v359_v27 = vmul.f32 %v223_v19, %v223_v19  ;;  %v367_v62 = vmul.f32 %v255_v20, %v255_v20 }
  0xf8   :  { %v546_v23 = vpack.c.bf16 %v620_v21, %v619_v17  ;;  %v226_v24 = vpop.f32.mrb[3].mxu0  ;;  %v566_v25 = vpack.c.bf16 %v628_v22, %v627_v18  ;;  %v258_v26 = vpop.f32.mrb[3].mxu1  ;;  %v362_v35 = vmul.f32 %v620_v21, %v620_v21  ;;  %v370_v7 = vmul.f32 %v628_v22, %v628_v22 }
  0xf9   :  { %v338_v28 = vadd.f32 %v226_v24, %v223_v19  ;;  %v360_v29 = vmul.f32 %v226_v24, %v226_v24  ;;  %v541_v30 = vpack.c.bf16 %v226_v24, %v223_v19  ;;  %v561_v31 = vpack.c.bf16 %v258_v26, %v255_v20 }
  0xfa   :  { %578 = vst [vmem:[%s771_s2 + $0x8] sm:$0xff] %v546_v23   ;;  %582 = vst [vmem:[%s771_s2 + $0x28] sm:$0xff] %v566_v25   ;;  %v368_v3 = vmul.f32 %v258_v26, %v258_v26 }
  0xfb   :  { %v339_v33 = vadd.f32 %v619_v17, %v338_v28  ;;  %v375_v34 = vadd.f32 %v360_v29, %v359_v27  ;;  %542 = vst [vmem:[%s771_s2] sm:$0xff] %v541_v30   ;;  %581 = vst [vmem:[%s771_s2 + $0x20] sm:$0xff] %v561_v31  }
  0xfd   :  { %v376_v36 = vadd.f32 %v375_v34, %v361_v32  ;;  %v623_v37 = vpop.f32.mrb[4].mxu0  ;;  %v340_v38 = vadd.f32 %v620_v21, %v339_v33  ;;  %v631_v39 = vpop.f32.mrb[4].mxu1  ;;  %v337_v33 = vld [vmem:[%s770_s3] sm:$0x3] }
  0xfe   :  { %v239_v40 = vpop.f32.mrb[5].mxu0  ;;  %v271_v41 = vpop.f32.mrb[5].mxu1  ;;  %v365_v56 = vmul.f32 %v623_v37, %v623_v37  ;;  %v373_v16 = vmul.f32 %v631_v39, %v631_v39 }
  0xff   :  { %v341_v42 = vadd.f32 %v340_v38, %v239_v40  ;;  %v363_v43 = vmul.f32 %v239_v40, %v239_v40  ;;  %v377_v44 = vadd.f32 %v376_v36, %v362_v35  ;;  %v624_v45 = vpop.f32.mrb[6].mxu0  ;;  %v632_v46 = vpop.f32.mrb[6].mxu1  ;;  %v371_v10 = vmul.f32 %v271_v41, %v271_v41 }
 0x100   :  { %v556_v47 = vpack.c.bf16 %v624_v45, %v623_v37  ;;  %v242_v48 = vpop.f32.mrb[7].mxu0  ;;  %v576_v49 = vpack.c.bf16 %v632_v46, %v631_v39  ;;  %v274_v50 = vpop.f32.mrb[7].mxu1  ;;  %v366_v59 = vmul.f32 %v624_v45, %v624_v45 }
 0x101   :  { %v378_v51 = vadd.f32 %v377_v44, %v363_v43  ;;  %v342_v52 = vadd.f32 %v341_v42, %v242_v48  ;;  %v364_v53 = vmul.f32 %v242_v48, %v242_v48  ;;  %v551_v54 = vpack.c.bf16 %v242_v48, %v239_v40 }
 0x102   :  { %580 = vst [vmem:[%s771_s2 + $0x18] sm:$0xff] %v556_v47   ;;  %584 = vst [vmem:[%s771_s2 + $0x38] sm:$0xff] %v576_v49   ;;  %v571_v55 = vpack.c.bf16 %v274_v50, %v271_v41  ;;  %v372_v15 = vmul.f32 %v274_v50, %v274_v50 }
 0x103   :  { %v343_v57 = vadd.f32 %v623_v37, %v342_v52  ;;  %v379_v58 = vadd.f32 %v378_v51, %v364_v53  ;;  %579 = vst [vmem:[%s771_s2 + $0x10] sm:$0xff] %v551_v54  }
 0x104   :  { %583 = vst [vmem:[%s771_s2 + $0x30] sm:$0xff] %v571_v55  }
 0x105   :  { %v380_v60 = vadd.f32 %v379_v58, %v365_v56  ;;  %v344_v61 = vadd.f32 %v624_v45, %v343_v57 }
 0x107   :  { %v345_v63 = vadd.f32 %v344_v61, %v255_v20  ;;  %v381_v0 = vadd.f32 %v380_v60, %v366_v59  ;;  %v374_v20 = vmul.f32 %v632_v46, %v632_v46 }
 0x109   :  { %v382_v1 = vadd.f32 %v381_v0, %v367_v62  ;;  %v346_v2 = vadd.f32 %v345_v63, %v258_v26 }
 0x10b   :  { %v347_v5 = vadd.f32 %v627_v18, %v346_v2  ;;  %v383_v6 = vadd.f32 %v382_v1, %v368_v3 }
 0x10d   :  { %v384_v8 = vadd.f32 %v383_v6, %v369_v4  ;;  %v348_v9 = vadd.f32 %v628_v22, %v347_v5 }
 0x10f   :  { %v349_v11 = vadd.f32 %v348_v9, %v271_v41  ;;  %v385_v12 = vadd.f32 %v384_v8, %v370_v7 }
 0x111   :  { %v386_v13 = vadd.f32 %v385_v12, %v371_v10  ;;  %v350_v14 = vadd.f32 %v349_v11, %v274_v50 }
 0x113   :  { %v351_v17 = vadd.f32 %v631_v39, %v350_v14  ;;  %v387_v19 = vadd.f32 %v386_v13, %v372_v15 }
 0x115   :  { %v352_v21 = vadd.f32 %v632_v46, %v351_v17  ;;  %v388_v23 = vadd.f32 %v387_v19, %v373_v16 }
 0x117   :  { %v353_v24 = vrot.slane %v352_v21, 4  ;;  %v389_v25 = vadd.f32 %v388_v23, %v374_v20 }
 0x119   :  { %v354_v26 = vadd.f32 %v353_v24, %v352_v21  ;;  %v390_v18 = vrot.slane %v389_v25, 4 }
 0x11b   :  { %v355_v27 = vrot.slane %v354_v26, 2  ;;  %v391_v28 = vadd.f32 %v390_v18, %v389_v25 }
 0x11d   :  { %v356_v29 = vadd.f32 %v355_v27, %v354_v26  ;;  %v392_v22 = vrot.slane %v391_v28, 2 }
 0x11f   :  { %v357_v30 = vrot.slane %v356_v29, 1  ;;  %v393_v31 = vadd.f32 %v392_v22, %v391_v28 }
 0x121   :  { %v394_v32 = vrot.slane %v393_v31, 1  ;;  %v358_v34 = vadd.f32 %v357_v30, %v356_v29 }
 0x123   :  { %v395_v35 = vadd.f32 %v394_v32, %v393_v31 }
 0x125   :  { %v397_v36 = vsel %vm396_vm0, %v358_v34, %v395_v35 }
 0x126   :  { %v398_v37 = vadd.f32 %v397_v36, %v337_v33 }
 0x128   :  { %399 = vst [vmem:[%s770_s3] sm:$0x3] %v398_v37 }

</bundles_post_ra>
